<compile_context>
chip_gen: v6e
topology: v6e:2x2x1
jax: 0.10.0
libtpu: 0.0.40
codegen_flags: <defaults>
</compile_context>

<pallas_src>
import jax
import jax.numpy as jnp
from jax.experimental import pallas as pl
from jax.experimental.pallas import tpu as pltpu


def embedder_kernel(x_ref, pos_ref, gate_ref, o_ref):
    # x_ref:    (TB, TL) block of flattened patch tokens (rows = batch)
    # pos_ref:  (1,  TL) positional-embedding slice (broadcast over rows)
    # gate_ref: (1,  TL) gating logits slice (BernoulliGating-style,
    #                    deterministic sigmoid gate at inference)
    x = x_ref[...].astype(jnp.float32)
    pos = pos_ref[...].astype(jnp.float32)
    # sigmoid lands on the EUP slot, which is idle in this HBM-bound kernel:
    # recomputing it per block is free filler -- do NOT hoist to the wrapper.
    gate = jax.nn.sigmoid(gate_ref[...].astype(jnp.float32))
    o_ref[...] = ((x + pos) * gate).astype(o_ref.dtype)


def _choose_lane_block(L, itemsize, target_bytes):
    """Lane (last-dim) tile: the full L if it fits (or can't be split on a
    128-lane boundary), else the largest 128-multiple divisor of L under
    target_bytes."""
    if L * itemsize <= target_bytes or L % 128 != 0:
        return L
    best = None
    t = 128
    while t < L:
        if L % t == 0 and t * itemsize <= target_bytes:
            best = t
        t += 128
    return best if best is not None else L


def _choose_row_block(B, row_bytes, target_bytes):
    """Row (sublane) tile: largest divisor of B that is either B itself or a
    multiple of 8 (TPU sublane tiling) and keeps the block under target."""
    candidates = [d for d in range(1, B + 1)
                  if B % d == 0 and (d == B or d % 8 == 0)]
    fitting = [d for d in candidates if d * row_bytes <= target_bytes]
    return max(fitting) if fitting else min(candidates)


def embedder_forward(x, pos_emb, gate_logits, *,
                     lane_block_bytes=512 * 1024,
                     block_bytes=2 * 1024 * 1024,
                     vmem_limit_bytes=64 * 1024 * 1024):
    """x: (B, N, C); pos_emb, gate_logits: (N, C).

    out = (x + pos_emb) * sigmoid(gate_logits), broadcast over the batch."""
    B, N, C = x.shape
    assert pos_emb.shape == (N, C) and gate_logits.shape == (N, C)
    L = N * C
    itemsize = jnp.dtype(x.dtype).itemsize

    # Lane-dense flattening: last dim becomes N*C (a multiple of 128 for
    # typical ViT shapes), so stores are full-width vst instead of 32/128
    # masked lanes.  The reshapes are contiguous -> free in XLA.
    x2 = x.reshape(B, L)
    pos2 = pos_emb.reshape(1, L)
    gate2 = gate_logits.reshape(1, L)

    tl = _choose_lane_block(L, itemsize, lane_block_bytes)
    tb = _choose_row_block(B, tl * itemsize, block_bytes)
    grid = (B // tb, L // tl)

    if grid[1] == 1:
        # pos/gate index_maps are constant across the grid: single-buffer them
        # so the second (never-used) VMEM buffer is not allocated; that VMEM
        # is better spent on the x / out blocks (matters most on v7x, 64 MiB).
        def shared_spec():
            return pl.BlockSpec((1, tl), lambda i, j: (0, 0),
                                pipeline_mode=pl.Buffered(1))
    else:
        def shared_spec():
            return pl.BlockSpec((1, tl), lambda i, j: (0, j))

    out2 = pl.pallas_call(
        embedder_kernel,
        out_shape=jax.ShapeDtypeStruct((B, L), x.dtype),
        grid_spec=pltpu.PrefetchScalarGridSpec(
            num_scalar_prefetch=0,
            grid=grid,
            in_specs=[
                pl.BlockSpec((tb, tl), lambda i, j: (i, j)),  # x block
                shared_spec(),                                # pos emb
                shared_spec(),                                # gate logits
            ],
            out_specs=pl.BlockSpec((tb, tl), lambda i, j: (i, j)),
        ),
        compiler_params=pltpu.CompilerParams(
            dimension_semantics=("parallel", "parallel"),
            vmem_limit_bytes=vmem_limit_bytes,
        ),
    )(x2, pos2, gate2)

    return out2.reshape(B, N, C)


def embedder_reference(x, pos_emb, gate_logits):
    xf = x.astype(jnp.float32)
    posf = pos_emb.astype(jnp.float32)
    gatef = jax.nn.sigmoid(gate_logits.astype(jnp.float32))
    return ((xf + posf[None]) * gatef[None]).astype(x.dtype)


if __name__ == "__main__":
    B, N, C = 2, 16, 32  # batch, num_patches, num_channels

    key = jax.random.PRNGKey(0)
    kx, kpos, kgate = jax.random.split(key, 3)

    # Deterministic synthetic inputs / parameters.
    x = jax.random.normal(kx, (B, N, C), dtype=jnp.float32)
    pos_emb = 0.02 * jax.random.normal(kpos, (N, C), dtype=jnp.float32)
    gate_logits = jax.random.normal(kgate, (N, C), dtype=jnp.float32)

    out = embedder_forward(x, pos_emb, gate_logits)
    out = jax.block_until_ready(out)

    ref = embedder_reference(x, pos_emb, gate_logits)
    assert out.shape == (B, N, C)
    assert jnp.allclose(out, ref, atol=1e-5, rtol=1e-5), "mismatch vs reference"

    print("KERNEL_OK")
</pallas_src>

<mosaic_0001>
module attributes {stable_mosaic.version = 11 : i64} {
  func.func @embedder_kernel(%arg0: i32, %arg1: i32, %arg2: memref<2x512xf32, #tpu.memory_space<vmem>>, %arg3: memref<1x512xf32, #tpu.memory_space<vmem>>, %arg4: memref<1x512xf32, #tpu.memory_space<vmem>>, %arg5: memref<2x512xf32, #tpu.memory_space<vmem>>) attributes {dimension_semantics = [#tpu.dimension_semantics<parallel>, #tpu.dimension_semantics<parallel>], iteration_bounds = array<i64: 1, 1>, scalar_prefetch = 0 : i64, scratch_operands = 0 : i64, tpu.core_type = #tpu.core_type<tc>, window_params = [{transform_indices = @transform_0, window_bounds = array<i64: 2, 512>}, {pipeline_mode = #tpu.pipeline_mode<synchronous>, transform_indices = @transform_1, window_bounds = array<i64: 1, 512>}, {pipeline_mode = #tpu.pipeline_mode<synchronous>, transform_indices = @transform_2, window_bounds = array<i64: 1, 512>}, {transform_indices = @transform_3, window_bounds = array<i64: 2, 512>}]} {
    %c0 = arith.constant 0 : index
    %c0_0 = arith.constant 0 : index
    %0 = vector.load %arg2[%c0, %c0_0] : memref<2x512xf32, #tpu.memory_space<vmem>>, vector<2x512xf32>
    %c0_1 = arith.constant 0 : index
    %c0_2 = arith.constant 0 : index
    %1 = vector.load %arg3[%c0_1, %c0_2] : memref<1x512xf32, #tpu.memory_space<vmem>>, vector<1x512xf32>
    %c0_3 = arith.constant 0 : index
    %c0_4 = arith.constant 0 : index
    %2 = vector.load %arg4[%c0_3, %c0_4] : memref<1x512xf32, #tpu.memory_space<vmem>>, vector<1x512xf32>
    %3 = arith.negf %2 : vector<1x512xf32>
    %4 = math.exp %3 : vector<1x512xf32>
    %cst = arith.constant 1.000000e+00 : f32
    %5 = vector.broadcast %cst : f32 to vector<1x512xf32>
    %6 = arith.addf %5, %4 : vector<1x512xf32>
    %7 = arith.divf %5, %6 : vector<1x512xf32>
    %8 = vector.broadcast %1 : vector<1x512xf32> to vector<2x512xf32>
    %9 = arith.addf %0, %8 : vector<2x512xf32>
    %10 = vector.broadcast %7 : vector<1x512xf32> to vector<2x512xf32>
    %11 = arith.mulf %9, %10 : vector<2x512xf32>
    %c0_5 = arith.constant 0 : index
    %c0_6 = arith.constant 0 : index
    %12 = vector.load %arg5[%c0_5, %c0_6] : memref<2x512xf32, #tpu.memory_space<vmem>>, vector<2x512xf32>
    tpu.vector_store %arg5[%c0_5, %c0_6], %11 {strides = array<i32>} : memref<2x512xf32, #tpu.memory_space<vmem>>, vector<2x512xf32>,
    return
  }
  func.func @transform_0(%arg0: i32, %arg1: i32) -> (i32, i32) {
    %c0_i32 = arith.constant 0 : i32
    return %arg0, %arg1 : i32, i32
  }
  func.func @transform_1(%arg0: i32, %arg1: i32) -> (i32, i32) {
    %c0_i32 = arith.constant 0 : i32
    %c0_i32_0 = arith.constant 0 : i32
    %c0_i32_1 = arith.constant 0 : i32
    return %c0_i32, %c0_i32_0 : i32, i32
  }
  func.func @transform_2(%arg0: i32, %arg1: i32) -> (i32, i32) {
    %c0_i32 = arith.constant 0 : i32
    %c0_i32_0 = arith.constant 0 : i32
    %c0_i32_1 = arith.constant 0 : i32
    return %c0_i32, %c0_i32_0 : i32, i32
  }
  func.func @transform_3(%arg0: i32, %arg1: i32) -> (i32, i32) {
    %c0_i32 = arith.constant 0 : i32
    return %arg0, %arg1 : i32, i32
  }
}

</mosaic_0001>

<bundles_post_ra>
// kernel: tpu_custom_call.1
= control target key start
LH: loop header
LB: loop body
LE: loop exit
PB: predicated region body
PF: predicated region fallthrough
CT: control target
= control target key end

     0   :  { %8 = vsyncpa [#allocation3], 0  ;;  %s281_s0 = inlined_call_operand.hbm [shape: f32[2,512], index: 0, kind: input, shape index: {}]   ;;  %s282_s1 = inlined_call_operand.hbm [shape: f32[1,512], index: 1, kind: input, shape index: {}]   ;;  %s283_s2 = inlined_call_operand.hbm [shape: f32[1,512], index: 2, kind: input, shape index: {}]   ;;  %s284_s3 = inlined_call_operand.hbm [shape: f32[2,512], index: 3, kind: output, shape index: {}]  }
   0x1   :  { %9 = vsyncpa [#allocation6], 0 }
   0x2   :  { %10 = vsyncpa [#allocation4], 0  ;;  %s244_s12 = smov [#allocation5]   ;;  %s245_s14 = smov [#allocation2]  }
   0x3   :  { %s27_s13 = sshll.u32 %s244_s12, 4  ;;  %s17_s15 = sshll.u32 %s245_s14, 4  ;;  %s28_s13 = int_to_ptr.vmem [resolvable:$true] %s27_s13  ;;  %s18_s15 = int_to_ptr.vmem [resolvable:$true] %s17_s15 }
   0x4   :  { %s166_s16 = scalar_lea.vmem %s28_s13, 64  ;;  %p171_p1 = scmp.lt.s32.totalorder %s28_s13, %s28_s13 }
   0x5   :  { %p167_p0 = scmp.ne.s32.totalorder %s28_s13, %s166_s16  ;;  %p172_p2 = scmp.lt.s32.totalorder %s166_s16, %s166_s16 }
   0x7   :  { %p173_p3 = por %p172_p2, %p171_p1 }
   0x9   :  { %p174_p4 = pnand %p173_p3, %p167_p0 }
   0xb   :  { %177 = shalt.err (!%p174_p4)
}
   0xc   :  { %30 = dma.hbm_to_vmem [thread:$0]  %s282_s1, 64, %s28_s13, [#allocation6]  }
   0xd   :  { %s186_s19 = scalar_lea.vmem %s18_s15, 128  ;;  %p191_p6 = scmp.lt.s32.totalorder %s18_s15, %s18_s15 }
   0xe   :  { %p187_p5 = scmp.ne.s32.totalorder %s18_s15, %s186_s19  ;;  %p192_p7 = scmp.lt.s32.totalorder %s186_s19, %s186_s19 }
  0x10   :  { %p193_p8 = por %p192_p7, %p191_p6 }
  0x12   :  { %p194_p9 = pnand %p193_p8, %p187_p5 }
  0x14   :  { %197 = shalt.err (!%p194_p9)
}
  0x15   :  { %20 = dma.hbm_to_vmem [thread:$0]  %s281_s0, 128, %s18_s15, [#allocation3]  }
  0x16   :  { %s246_s22 = smov [#allocation7]  }
  0x17   :  { %s37_s23 = sshll.u32 %s246_s22, 4  ;;  %s38_s23 = int_to_ptr.vmem [resolvable:$true] %s37_s23 }
  0x18   :  { %s206_s24 = scalar_lea.vmem %s38_s23, 64  ;;  %p211_p11 = scmp.lt.s32.totalorder %s38_s23, %s38_s23 }
  0x19   :  { %p207_p10 = scmp.ne.s32.totalorder %s38_s23, %s206_s24  ;;  %p212_p12 = scmp.lt.s32.totalorder %s206_s24, %s206_s24 }
  0x1b   :  { %p213_p13 = por %p212_p12, %p211_p11 }
  0x1d   :  { %p214_p0 = pnand %p213_p13, %p207_p10 }
  0x1f   :  { %217 = shalt.err (!%p214_p0)
}
  0x20   :  { %40 = dma.hbm_to_vmem [thread:$0]  %s283_s2, 64, %s38_s23, [#allocation6]  }
  0x21   :  { %238 = dma.done.wait [#allocation3], 128  }
  0x22   :  { %239 = vsyncadd [#allocation3], 4294967168 }
  0x23   :  { %240 = dma.done.wait [#allocation6], 128  }
  0x24   :  { %241 = vsyncadd [#allocation6], 4294967168  ;;  %v52_v0 = vld [vmem:[#allocation7] sm:$0xf]  ;;  %v60_v2 = vlaneseq  ;;  %v247_v4 = vmov 1983009808  }
  0x25   :  { %v148_v1 = vmul.f32 -1.442695, %v52_v0  ;;  %v79_v5 = vunpack.c.l.s4 %v247_v4  ;;  %v51_v12 = vld [vmem:[#allocation5] sm:$0xf]  ;;  %v50_v29 = vld [vmem:[#allocation2] sm:$0xff]  ;;  %s248_s0 = smov [#allocation8]  }
  0x26   :  { %v61_v3 = vshrl.u32 %v60_v2, 7  ;;  %s138_s2 = sshll.u32 %s248_s0, 4  ;;  %s139_s2 = int_to_ptr.vmem [resolvable:$true] %s138_s2 }
  0x27   :  { %154 = vpow2.f32 %v148_v1  ;;  %v80_v13 = vunpack.c.0.s8 %v79_v5  ;;  %s218_s26 = scalar_lea.vmem %s139_s2, 128  ;;  %p223_p2 = scmp.lt.s32.totalorder %s139_s2, %s139_s2 }
  0x28   :  { %v62_v7 = vsub.s32 0, %v61_v3  ;;  %v66_v8 = vsub.s32 1, %v61_v3  ;;  %v70_v9 = vsub.s32 2, %v61_v3  ;;  %v74_v10 = vsub.s32 3, %v61_v3  ;;  %p219_p1 = scmp.ne.s32.totalorder %s139_s2, %s218_s26  ;;  %p224_p3 = scmp.lt.s32.totalorder %s218_s26, %s218_s26 }
  0x29   :  { %v83_v20 = vsub.s32 %v80_v13, %v61_v3 }
  0x2a   :  { %v63_v14 = vrot.slane %v51_v12, %v62_v7  ;;  %v67_v15 = vrot.slane %v51_v12, %v66_v8  ;;  %v71_v16 = vrot.slane %v51_v12, %v70_v9  ;;  %v75_v17 = vrot.slane %v51_v12, %v74_v10  ;;  %p225_p4 = por %p224_p3, %p223_p2 }
  0x2c   :  { %v76_v18 = vcombine.low %v63_v14, %v67_v15  ;;  %v77_v19 = vcombine.low %v71_v16, %v75_v17  ;;  %p226_p5 = pnand %p225_p4, %p219_p1 }
  0x2e   :  { %v84_v21 = vrot.slane %v76_v18, %v83_v20  ;;  %v91_v22 = vrot.slane %v77_v19, %v83_v20 }
  0x30   :  { %v92_v24 = vcombine.low %v84_v21, %v91_v22 }
  0x32   :  { %v94_v32 = vadd.f32 %v92_v24, %v50_v29 }
  0x34   :  { %v155_v6 = vpop.eup %154 }
  0x35   :  { %v56_v11 = vadd.f32 1.0, %v155_v6 }
  0x37   :  { %156 = vrcp.f32 %v56_v11 }
  0x44   :  { %v157_v23 = vpop.eup %156 }
  0x45   :  { %v99_v25 = vrot.slane %v157_v23, %v62_v7  ;;  %v103_v26 = vrot.slane %v157_v23, %v66_v8  ;;  %v107_v27 = vrot.slane %v157_v23, %v70_v9  ;;  %v111_v28 = vrot.slane %v157_v23, %v74_v10 }
  0x47   :  { %v112_v30 = vcombine.low %v99_v25, %v103_v26  ;;  %v113_v31 = vcombine.low %v107_v27, %v111_v28 }
  0x49   :  { %v120_v33 = vrot.slane %v112_v30, %v83_v20  ;;  %v127_v34 = vrot.slane %v113_v31, %v83_v20 }
  0x4b   :  { %v128_v35 = vcombine.low %v120_v33, %v127_v34 }
  0x4d   :  { %v130_v36 = vmul.f32 %v128_v35, %v94_v32 }
  0x4f   :  { %131 = vst [vmem:[#allocation8] sm:$0xff] %v130_v36 }
  0x50   :  { %229 = shalt.err (!%p226_p5)
}
  0x51   :  { %141 = dma.vmem_to_hbm [thread:$0]  %s139_s2, 128, %s284_s3, [#allocation4]  }
  0x52   :  { %242 = dma.done.wait [#allocation4], 128  }
  0x53   :  { %243 = vsyncadd [#allocation4], 4294967168 }
  0x54   :  { %145 = vsyncpa [#allocation3], 1 }
  0x55   :  { %146 = vsyncpa [#allocation6], 1 }
  0x56   :  { %147 = vsyncpa [#allocation4], 1 }

</bundles_post_ra>
